<compile_context>
chip_gen: v7x
topology: tpu7x:2x2x1
jax: 0.10.0
libtpu: 0.0.40
codegen_flags: <defaults>
</compile_context>

<pallas_src>
import jax
import jax.numpy as jnp
import numpy as np
from jax.experimental import pallas as pl
from jax.experimental.pallas import tpu as pltpu


def _round_up(v, m):
    return (v + m - 1) // m * m


# --------------------------------------------------------------------------
# Pallas kernel (one grid step == one block of TB batch rows)
# --------------------------------------------------------------------------
def _make_kernel(TB, L, Lpad, pad, Kmax, Kpad, C_out, C_out_pad):
    def kernel(x_ref, w_ref, shift_ref, wstatT_ref, bstat_ref, out_ref):
        x = x_ref[...]                                             # (TB, L) raw rows

        # In-kernel zero padding (no wrapper-side HBM pad pass).  Lpad >= L + pad, so
        # every column that wraps around in the rolls below is guaranteed to be zero.
        xp = jnp.concatenate(
            [x, jnp.zeros((TB, Lpad - L), jnp.float32)], axis=1)   # (TB, Lpad)

        # im2col: fused-conv tap j needs x[:, l + j - pad].  Each tap is one lane roll
        # of the whole block (XLU slot) followed by a lane-aligned [:, :L] slice.
        slabs = []
        for j in range(Kmax):
            s = (pad - j) % Lpad
            r = pltpu.roll(xp, shift=s, axis=1) if s else xp
            slabs.append(r[:, :L])
        for _ in range(Kpad - Kmax):                               # pad tap axis to 8
            slabs.append(jnp.zeros((TB, L), jnp.float32))
        m = jnp.stack(slabs, axis=1)                               # (TB, Kpad, L)

        # One batched MXU contraction for every row and every conv branch
        # (BN scale/shift already folded into w/shift; stats rows are zero).
        w_b = jnp.broadcast_to(w_ref[...], (TB, C_out_pad, Kpad))
        conv = jnp.einsum("tck,tkl->tcl", w_b, m,
                          preferred_element_type=jnp.float32,
                          precision=jax.lax.Precision.HIGHEST)     # (TB, C_out_pad, L)
        act = jnp.maximum(conv + shift_ref[...][None], 0.0)        # stats rows: relu(0)=0

        # Statistics branch, vectorized over the whole block (lane-axis reductions).
        mean = jnp.mean(x, axis=1, keepdims=True)                  # (TB, 1)
        var = jnp.sum((x - mean) ** 2, axis=1, keepdims=True) / (L - 1)   # unbiased std
        std = jnp.sqrt(var)
        mx = jnp.max(x, axis=1, keepdims=True)
        mn = jnp.min(x, axis=1, keepdims=True)
        wsT = wstatT_ref[...]                                      # (4, C_out_pad), zero on conv cols
        sf = (mean * wsT[0:1, :] + std * wsT[1:2, :]
              + mx * wsT[2:3, :] + mn * wsT[3:4, :]
              + bstat_ref[...])                                    # (TB, C_out_pad)

        out_val = act + sf[:, :, None]                             # aligned add, no concat
        if C_out_pad > C_out:
            out_val = out_val[:, :C_out, :]                        # drop trailing pad rows
        out_ref[...] = out_val                                     # one aligned store / block

    return kernel


# --------------------------------------------------------------------------
# Block-size heuristic (VMEM-budget aware, keeps >=2 steps for v7x when possible)
# --------------------------------------------------------------------------
def _choose_tb(B, L, C_out, Kpad):
    B8 = _round_up(max(B, 1), 8)
    # Per-row bytes: double-buffered in/out blocks + padded row + im2col + matmul temps.
    per_row = 4 * L * (5 * C_out + 3 * Kpad + 6)
    tb = (10 << 20) // max(per_row, 1)          # ~10 MiB block: safe under v5e's 16 MiB
    tb = max(8, min(256, (tb // 8) * 8))
    tb = min(tb, B8)
    if B8 // tb < 2 and B8 >= 16:               # keep >=2 parallel steps (v7x: 2 TCs)
        tb = max(8, ((B8 // 2) // 8) * 8)
    while B8 % tb:                              # exact grid
        tb -= 8
    return tb, B8


# --------------------------------------------------------------------------
# Wrapper: parameter folding + pallas_call
# --------------------------------------------------------------------------
def time_feature_extractor(x, params, *, d_model, window_sizes):
    B, L = x.shape
    n = len(window_sizes)
    C = d_model // n
    nC = n * C
    C_out = (n + 1) * C
    eps = 1e-5

    assert all(k % 2 == 1 for k in window_sizes), \
        "even window sizes make the reference module's torch.cat ill-defined"
    Kmax = max(window_sizes)
    pad = Kmax // 2
    Kpad = _round_up(Kmax, 8)
    C_out_pad = _round_up(C_out, 8)
    Lpad = _round_up(L + pad, 128)
    assert Lpad >= L + pad                      # roll wrap-around columns must be zero

    # Fold eval-mode BN into the conv weights/bias and stack every branch into one
    # (C_out_pad, Kpad) matrix; rows for the statistics channels stay zero.
    w_ext = jnp.zeros((C_out_pad, Kpad), jnp.float32)
    shift_ext = jnp.zeros((C_out_pad, 1), jnp.float32)
    for bi, K in enumerate(window_sizes):
        w = params[f"conv{bi}_w"][:, 0, :]                                  # (C, K)
        b = params[f"conv{bi}_b"]
        scale = params[f"bn{bi}_gamma"] / jnp.sqrt(params[f"bn{bi}_var"] + eps)
        off = (Kmax - K) // 2                                               # tap offset in shared window
        r0 = bi * C
        w_ext = w_ext.at[r0:r0 + C, off:off + K].set(scale[:, None] * w)
        shift_ext = shift_ext.at[r0:r0 + C, 0].set(
            scale * (b - params[f"bn{bi}_mean"]) + params[f"bn{bi}_beta"])

    # Statistics projection, transposed + padded so conv channels see zeros.
    wstatT = jnp.zeros((4, C_out_pad), jnp.float32).at[:, nC:nC + C].set(params["stat_w"].T)
    bstat = jnp.zeros((1, C_out_pad), jnp.float32).at[0, nC:nC + C].set(params["stat_b"])

    TB, B8 = _choose_tb(B, L, C_out, Kpad)
    x_p = x if B8 == B else jnp.pad(x, ((0, B8 - B), (0, 0)))   # batch pad only (<=7 rows)

    kernel = _make_kernel(TB, L, Lpad, pad, Kmax, Kpad, C_out, C_out_pad)

    def fixed(shape):
        nd = len(shape)
        return pl.BlockSpec(shape, lambda i, _nd=nd: (0,) * _nd)

    out = pl.pallas_call(
        kernel,
        out_shape=jax.ShapeDtypeStruct((B8, C_out, L), jnp.float32),
        grid_spec=pltpu.PrefetchScalarGridSpec(
            num_scalar_prefetch=0,
            grid=(B8 // TB,),
            in_specs=[
                pl.BlockSpec((TB, L), lambda i: (i, 0)),          # raw rows, no pre-pad
                fixed((C_out_pad, Kpad)),
                fixed((C_out_pad, 1)),
                fixed((4, C_out_pad)),
                fixed((1, C_out_pad)),
            ],
            out_specs=pl.BlockSpec((TB, C_out, L), lambda i: (i, 0, 0)),
        ),
        compiler_params=pltpu.CompilerParams(
            dimension_semantics=("parallel",)),                   # v7x: split batch blocks over TCs
        cost_estimate=pl.CostEstimate(
            flops=2 * B8 * C_out_pad * Kpad * L,
            transcendentals=0,
            bytes_accessed=4 * (B8 * L + B8 * C_out * L)),
    )(x_p, w_ext, shift_ext, wstatT, bstat)
    return out[:B] if B8 != B else out


# --------------------------------------------------------------------------
# Deterministic parameter init (matches nn.Module shapes of a fresh module)
# --------------------------------------------------------------------------
def init_params(key, d_model, window_sizes):
    n = len(window_sizes)
    C = d_model // n
    params = {}
    keys = jax.random.split(key, 2 * n + 2)
    ki = 0
    for bi, K in enumerate(window_sizes):
        bound = 1.0 / np.sqrt(1 * K)
        params[f"conv{bi}_w"] = jax.random.uniform(
            keys[ki], (C, 1, K), jnp.float32, -bound, bound); ki += 1
        params[f"conv{bi}_b"] = jax.random.uniform(
            keys[ki], (C,), jnp.float32, -bound, bound); ki += 1
        params[f"bn{bi}_gamma"] = jnp.ones((C,), jnp.float32)
        params[f"bn{bi}_beta"] = jnp.zeros((C,), jnp.float32)
        params[f"bn{bi}_mean"] = jnp.zeros((C,), jnp.float32)
        params[f"bn{bi}_var"] = jnp.ones((C,), jnp.float32)
    bound = 1.0 / np.sqrt(4.0)
    params["stat_w"] = jax.random.uniform(keys[ki], (C, 4), jnp.float32, -bound, bound); ki += 1
    params["stat_b"] = jax.random.uniform(keys[ki], (C,), jnp.float32, -bound, bound)
    return params


# --------------------------------------------------------------------------
# Pure-JAX reference (exact f32, elementwise conv) for validation
# --------------------------------------------------------------------------
def reference(x, params, *, d_model, window_sizes):
    n = len(window_sizes)
    C = d_model // n
    B, L = x.shape
    eps = 1e-5
    feats = []
    for bi, K in enumerate(window_sizes):
        w = params[f"conv{bi}_w"][:, 0, :]                         # (C, K)
        b = params[f"conv{bi}_b"]
        xp = jnp.pad(x, ((0, 0), (K // 2, K // 2)))
        conv = jnp.zeros((B, C, L), jnp.float32)
        for k in range(K):                                         # exact f32 shift-and-add
            conv = conv + w[None, :, k:k + 1] * xp[:, None, k:k + L]
        conv = conv + b[None, :, None]
        bn = (conv - params[f"bn{bi}_mean"][None, :, None]) / jnp.sqrt(
            params[f"bn{bi}_var"][None, :, None] + eps)
        bn = bn * params[f"bn{bi}_gamma"][None, :, None] + params[f"bn{bi}_beta"][None, :, None]
        feats.append(jnp.maximum(bn, 0.0))
    mean = x.mean(axis=1)
    std = jnp.sqrt(((x - mean[:, None]) ** 2).sum(axis=1) / (L - 1))
    stats = jnp.stack([mean, std, x.max(axis=1), x.min(axis=1)], axis=1)   # (B, 4)
    sf = params["stat_b"][None, :]
    for j in range(4):                                                      # exact f32 linear
        sf = sf + stats[:, j:j + 1] * params["stat_w"][None, :, j]
    feats.append(jnp.broadcast_to(sf[:, :, None], (B, C, L)))
    return jnp.concatenate(feats, axis=1)


if __name__ == "__main__":
    B, L = 4, 128
    d_model = 12
    window_sizes = [3, 5, 7]   # odd kernels so the module's channel concat is valid

    x = jax.random.normal(jax.random.PRNGKey(0), (B, L), jnp.float32)
    params = init_params(jax.random.PRNGKey(42), d_model, window_sizes)

    out = jax.block_until_ready(
        time_feature_extractor(x, params, d_model=d_model, window_sizes=window_sizes))

    ref = reference(x, params, d_model=d_model, window_sizes=window_sizes)
    n = len(window_sizes)
    C = d_model // n
    assert out.shape == (B, (n + 1) * C, L)
    # Conv channels go through the MXU with Precision.HIGHEST f32 -> near-exact.
    np.testing.assert_allclose(np.asarray(out), np.asarray(ref), rtol=5e-3, atol=5e-3)
    # Statistics channels never touch the MXU -> tight exact-f32 check.
    np.testing.assert_allclose(np.asarray(out[:, n * C:, :]),
                               np.asarray(ref[:, n * C:, :]), rtol=1e-4, atol=1e-4)
    print("KERNEL_OK")
</pallas_src>

<mosaic_0001>
module attributes {stable_mosaic.version = 11 : i64} {
  func.func @kernel(%arg0: i32, %arg1: memref<8x128xf32, #tpu.memory_space<vmem>>, %arg2: memref<16x8xf32, #tpu.memory_space<vmem>>, %arg3: memref<16x1xf32, #tpu.memory_space<vmem>>, %arg4: memref<4x16xf32, #tpu.memory_space<vmem>>, %arg5: memref<1x16xf32, #tpu.memory_space<vmem>>, %arg6: memref<8x16x128xf32, #tpu.memory_space<vmem>>) attributes {dimension_semantics = [#tpu.dimension_semantics<parallel>], iteration_bounds = array<i64: 1>, scalar_prefetch = 0 : i64, scratch_operands = 0 : i64, tpu.core_type = #tpu.core_type<tc>, window_params = [{transform_indices = @transform_0, window_bounds = array<i64: 8, 128>}, {pipeline_mode = #tpu.pipeline_mode<synchronous>, transform_indices = @transform_1, window_bounds = array<i64: 16, 8>}, {pipeline_mode = #tpu.pipeline_mode<synchronous>, transform_indices = @transform_2, window_bounds = array<i64: 16, 1>}, {pipeline_mode = #tpu.pipeline_mode<synchronous>, transform_indices = @transform_3, window_bounds = array<i64: 4, 16>}, {pipeline_mode = #tpu.pipeline_mode<synchronous>, transform_indices = @transform_4, window_bounds = array<i64: 1, 16>}, {transform_indices = @transform_5, window_bounds = array<i64: 8, 16, 128>}]} {
    %c0 = arith.constant 0 : index
    %c0_0 = arith.constant 0 : index
    %0 = vector.load %arg1[%c0, %c0_0] : memref<8x128xf32, #tpu.memory_space<vmem>>, vector<8x128xf32>
    %cst = arith.constant 0.000000e+00 : f32
    %1 = vector.broadcast %cst : f32 to vector<8x128xf32>
    %2 = tpu.concatenate %0, %1 in 1 : vector<8x128xf32>, vector<8x128xf32> -> vector<8x256xf32>
    %c3_i32 = arith.constant 3 : i32
    %3 = tpu.dynamic_rotate %2 by %c3_i32 dim 1 : vector<8x256xf32>, i32 -> vector<8x256xf32>
    %4 = vector.extract_strided_slice %3 {offsets = [0, 0], sizes = [8, 128], strides = [1, 1]} : vector<8x256xf32> to vector<8x128xf32>
    %c2_i32 = arith.constant 2 : i32
    %5 = tpu.dynamic_rotate %2 by %c2_i32 dim 1 : vector<8x256xf32>, i32 -> vector<8x256xf32>
    %6 = vector.extract_strided_slice %5 {offsets = [0, 0], sizes = [8, 128], strides = [1, 1]} : vector<8x256xf32> to vector<8x128xf32>
    %c1_i32 = arith.constant 1 : i32
    %7 = tpu.dynamic_rotate %2 by %c1_i32 dim 1 : vector<8x256xf32>, i32 -> vector<8x256xf32>
    %8 = vector.extract_strided_slice %7 {offsets = [0, 0], sizes = [8, 128], strides = [1, 1]} : vector<8x256xf32> to vector<8x128xf32>
    %9 = vector.extract_strided_slice %2 {offsets = [0, 0], sizes = [8, 128], strides = [1, 1]} : vector<8x256xf32> to vector<8x128xf32>
    %c255_i32 = arith.constant 255 : i32
    %10 = tpu.dynamic_rotate %2 by %c255_i32 dim 1 : vector<8x256xf32>, i32 -> vector<8x256xf32>
    %11 = vector.extract_strided_slice %10 {offsets = [0, 0], sizes = [8, 128], strides = [1, 1]} : vector<8x256xf32> to vector<8x128xf32>
    %c254_i32 = arith.constant 254 : i32
    %12 = tpu.dynamic_rotate %2 by %c254_i32 dim 1 : vector<8x256xf32>, i32 -> vector<8x256xf32>
    %13 = vector.extract_strided_slice %12 {offsets = [0, 0], sizes = [8, 128], strides = [1, 1]} : vector<8x256xf32> to vector<8x128xf32>
    %c253_i32 = arith.constant 253 : i32
    %14 = tpu.dynamic_rotate %2 by %c253_i32 dim 1 : vector<8x256xf32>, i32 -> vector<8x256xf32>
    %15 = vector.extract_strided_slice %14 {offsets = [0, 0], sizes = [8, 128], strides = [1, 1]} : vector<8x256xf32> to vector<8x128xf32>
    %cst_1 = arith.constant 0.000000e+00 : f32
    %16 = vector.broadcast %cst_1 : f32 to vector<8x128xf32>
    %17 = vector.shape_cast %4 : vector<8x128xf32> to vector<8x1x128xf32>
    %18 = vector.shape_cast %6 : vector<8x128xf32> to vector<8x1x128xf32>
    %19 = vector.shape_cast %8 : vector<8x128xf32> to vector<8x1x128xf32>
    %20 = vector.shape_cast %9 : vector<8x128xf32> to vector<8x1x128xf32>
    %21 = vector.shape_cast %11 : vector<8x128xf32> to vector<8x1x128xf32>
    %22 = vector.shape_cast %13 : vector<8x128xf32> to vector<8x1x128xf32>
    %23 = vector.shape_cast %15 : vector<8x128xf32> to vector<8x1x128xf32>
    %24 = vector.shape_cast %16 : vector<8x128xf32> to vector<8x1x128xf32>
    %25 = tpu.concatenate %17, %18, %19, %20, %21, %22, %23, %24 in 1 : vector<8x1x128xf32>, vector<8x1x128xf32>, vector<8x1x128xf32>, vector<8x1x128xf32>, vector<8x1x128xf32>, vector<8x1x128xf32>, vector<8x1x128xf32>, vector<8x1x128xf32> -> vector<8x8x128xf32>
    %c0_2 = arith.constant 0 : index
    %c0_3 = arith.constant 0 : index
    %26 = vector.load %arg2[%c0_2, %c0_3] : memref<16x8xf32, #tpu.memory_space<vmem>>, vector<16x8xf32>
    %27 = vector.shape_cast %26 : vector<16x8xf32> to vector<1x16x8xf32>
    %28 = vector.broadcast %27 : vector<1x16x8xf32> to vector<8x16x8xf32>
    "tpu.trace_start"() <{level = 10 : i32, message = "tck,tkl->tcl"}> : () -> ()
    %cst_4 = arith.constant dense<0.000000e+00> : vector<8x16x128xf32>
    %29 = tpu.matmul %28, %25, %cst_4 {dimension_numbers = #tpu.dot_dimension_numbers<[2], [1], [1], [2], [0, 0, 0, 1, 1, 2], [0], [0]>, precision = #tpu.contract_precision<fp32>} : vector<8x16x8xf32>, vector<8x8x128xf32>, vector<8x16x128xf32> -> vector<8x16x128xf32>
    "tpu.trace_stop"() : () -> ()
    %c0_5 = arith.constant 0 : index
    %c0_6 = arith.constant 0 : index
    %30 = vector.load %arg3[%c0_5, %c0_6] : memref<16x1xf32, #tpu.memory_space<vmem>>, vector<16x1xf32>
    %31 = vector.shape_cast %30 : vector<16x1xf32> to vector<1x16x1xf32>
    %32 = vector.broadcast %31 : vector<1x16x1xf32> to vector<8x16x128xf32>
    %33 = arith.addf %29, %32 : vector<8x16x128xf32>
    %cst_7 = arith.constant 0.000000e+00 : f32
    %34 = vector.broadcast %cst_7 : f32 to vector<8x16x128xf32>
    %35 = arith.maximumf %33, %34 : vector<8x16x128xf32>
    %cst_8 = arith.constant dense<0.000000e+00> : vector<8xf32>
    %36 = vector.multi_reduction <add>, %0, %cst_8 [1] : vector<8x128xf32> to vector<8xf32>
    %37 = vector.shape_cast %36 : vector<8xf32> to vector<8x1xf32>
    %cst_9 = arith.constant 1.280000e+02 : f32
    %38 = vector.broadcast %cst_9 : f32 to vector<8x1xf32>
    %39 = arith.divf %37, %38 : vector<8x1xf32>
    %40 = vector.broadcast %39 : vector<8x1xf32> to vector<8x128xf32>
    %41 = arith.subf %0, %40 : vector<8x128xf32>
    %42 = arith.mulf %41, %41 : vector<8x128xf32>
    %cst_10 = arith.constant dense<0.000000e+00> : vector<8xf32>
    %43 = vector.multi_reduction <add>, %42, %cst_10 [1] : vector<8x128xf32> to vector<8xf32>
    %44 = vector.shape_cast %43 : vector<8xf32> to vector<8x1xf32>
    %cst_11 = arith.constant 1.270000e+02 : f32
    %45 = vector.broadcast %cst_11 : f32 to vector<8x1xf32>
    %46 = arith.divf %44, %45 : vector<8x1xf32>
    %47 = math.sqrt %46 : vector<8x1xf32>
    %cst_12 = arith.constant dense<0xFF800000> : vector<8xf32>
    %48 = vector.multi_reduction <maximumf>, %0, %cst_12 [1] : vector<8x128xf32> to vector<8xf32>
    %49 = vector.shape_cast %48 : vector<8xf32> to vector<8x1xf32>
    %cst_13 = arith.constant dense<0x7F800000> : vector<8xf32>
    %50 = vector.multi_reduction <minimumf>, %0, %cst_13 [1] : vector<8x128xf32> to vector<8xf32>
    %51 = vector.shape_cast %50 : vector<8xf32> to vector<8x1xf32>
    %c0_14 = arith.constant 0 : index
    %c0_15 = arith.constant 0 : index
    %52 = vector.load %arg4[%c0_14, %c0_15] : memref<4x16xf32, #tpu.memory_space<vmem>>, vector<4x16xf32>
    %53 = vector.extract_strided_slice %52 {offsets = [0, 0], sizes = [1, 16], strides = [1, 1]} : vector<4x16xf32> to vector<1x16xf32>
    %54 = vector.broadcast %39 : vector<8x1xf32> to vector<8x16xf32>
    %55 = vector.broadcast %53 : vector<1x16xf32> to vector<8x16xf32>
    %56 = arith.mulf %54, %55 : vector<8x16xf32>
    %57 = vector.extract_strided_slice %52 {offsets = [1, 0], sizes = [1, 16], strides = [1, 1]} : vector<4x16xf32> to vector<1x16xf32>
    %58 = vector.broadcast %47 : vector<8x1xf32> to vector<8x16xf32>
    %59 = vector.broadcast %57 : vector<1x16xf32> to vector<8x16xf32>
    %60 = arith.mulf %58, %59 : vector<8x16xf32>
    %61 = arith.addf %56, %60 : vector<8x16xf32>
    %62 = vector.extract_strided_slice %52 {offsets = [2, 0], sizes = [1, 16], strides = [1, 1]} : vector<4x16xf32> to vector<1x16xf32>
    %63 = vector.broadcast %49 : vector<8x1xf32> to vector<8x16xf32>
    %64 = vector.broadcast %62 : vector<1x16xf32> to vector<8x16xf32>
    %65 = arith.mulf %63, %64 : vector<8x16xf32>
    %66 = arith.addf %61, %65 : vector<8x16xf32>
    %67 = vector.extract_strided_slice %52 {offsets = [3, 0], sizes = [1, 16], strides = [1, 1]} : vector<4x16xf32> to vector<1x16xf32>
    %68 = vector.broadcast %51 : vector<8x1xf32> to vector<8x16xf32>
    %69 = vector.broadcast %67 : vector<1x16xf32> to vector<8x16xf32>
    %70 = arith.mulf %68, %69 : vector<8x16xf32>
    %71 = arith.addf %66, %70 : vector<8x16xf32>
    %c0_16 = arith.constant 0 : index
    %c0_17 = arith.constant 0 : index
    %72 = vector.load %arg5[%c0_16, %c0_17] : memref<1x16xf32, #tpu.memory_space<vmem>>, vector<1x16xf32>
    %73 = vector.broadcast %72 : vector<1x16xf32> to vector<8x16xf32>
    %74 = arith.addf %71, %73 : vector<8x16xf32>
    %75 = vector.shape_cast %74 : vector<8x16xf32> to vector<8x16x1xf32>
    %76 = vector.broadcast %75 : vector<8x16x1xf32> to vector<8x16x128xf32>
    %77 = arith.addf %35, %76 : vector<8x16x128xf32>
    %c0_18 = arith.constant 0 : index
    %c0_19 = arith.constant 0 : index
    %c0_20 = arith.constant 0 : index
    %78 = vector.load %arg6[%c0_18, %c0_19, %c0_20] : memref<8x16x128xf32, #tpu.memory_space<vmem>>, vector<8x16x128xf32>
    tpu.vector_store %arg6[%c0_18, %c0_19, %c0_20], %77 {strides = array<i32>} : memref<8x16x128xf32, #tpu.memory_space<vmem>>, vector<8x16x128xf32>,
    return
  }
  func.func @transform_0(%arg0: i32) -> (i32, i32) {
    %c0_i32 = arith.constant 0 : i32
    %c0_i32_0 = arith.constant 0 : i32
    return %arg0, %c0_i32 : i32, i32
  }
  func.func @transform_1(%arg0: i32) -> (i32, i32) {
    %c0_i32 = arith.constant 0 : i32
    %c0_i32_0 = arith.constant 0 : i32
    %c0_i32_1 = arith.constant 0 : i32
    return %c0_i32, %c0_i32_0 : i32, i32
  }
  func.func @transform_2(%arg0: i32) -> (i32, i32) {
    %c0_i32 = arith.constant 0 : i32
    %c0_i32_0 = arith.constant 0 : i32
    %c0_i32_1 = arith.constant 0 : i32
    return %c0_i32, %c0_i32_0 : i32, i32
  }
  func.func @transform_3(%arg0: i32) -> (i32, i32) {
    %c0_i32 = arith.constant 0 : i32
    %c0_i32_0 = arith.constant 0 : i32
    %c0_i32_1 = arith.constant 0 : i32
    return %c0_i32, %c0_i32_0 : i32, i32
  }
  func.func @transform_4(%arg0: i32) -> (i32, i32) {
    %c0_i32 = arith.constant 0 : i32
    %c0_i32_0 = arith.constant 0 : i32
    %c0_i32_1 = arith.constant 0 : i32
    return %c0_i32, %c0_i32_0 : i32, i32
  }
  func.func @transform_5(%arg0: i32) -> (i32, i32, i32) {
    %c0_i32 = arith.constant 0 : i32
    %c0_i32_0 = arith.constant 0 : i32
    %c0_i32_1 = arith.constant 0 : i32
    return %arg0, %c0_i32, %c0_i32_0 : i32, i32, i32
  }
}

</mosaic_0001>

<bundles_post_ra>
// kernel: tpu_custom_call.1
= control target key start
LH: loop header
LB: loop body
LE: loop exit
PB: predicated region body
PF: predicated region fallthrough
CT: control target
= control target key end

     0   :  { %s5381_s20 = smov 1   ;;  %s5382_s21 = smov 2   ;;  %s5990_s0 = inlined_call_operand.vmem [shape: f32[8,128], index: 0, kind: input, shape index: {}]   ;;  %s5991_s1 = inlined_call_operand.vmem [shape: f32[16,8], index: 1, kind: input, shape index: {}]   ;;  %s5992_s2 = inlined_call_operand.vmem [shape: f32[16,1], index: 2, kind: input, shape index: {}]   ;;  %s5993_s3 = inlined_call_operand.vmem [shape: f32[4,16], index: 3, kind: input, shape index: {}]   ;;  %s5994_s4 = inlined_call_operand.vmem [shape: f32[1,16], index: 4, kind: input, shape index: {}]   ;;  %s5995_s5 = inlined_call_operand.hbm [shape: f32[8,16,128], index: 5, kind: output, shape index: {}]  }
   0x1   :  { %v5426_v0 = vld [vmem:[%s5990_s0] sm:$0xff] }
   0x2   :  { %36 = vrot.lane.b32.xlu1 %v5426_v0, %s5381_s20  ;;  %30 = vrot.lane.b32.xlu0 %v5426_v0, %s5382_s21 }
   0x3   :  { %10 = vsyncpa [#allocation3], 0  ;;  %v5383_v1 = vmov 0.0   ;;  %s5384_s22 = smov 3   ;;  %s5385_s23 = smov 127   ;;  %v721_v2 = vld [vmem:[%s5991_s1] sm:$0xff]  ;;  %v26_v9 = vlaneseq  ;;  %v219_v15 = vcombine.high %v5426_v0, %v5426_v0 }
   0x4   :  { %s5386_s0 = smov 126   ;;  %s5387_s24 = smov 125   ;;  %vm735_vm0 = vcmask 64512   ;;  %v5388_v10 = vmov 1966171168   ;;  %v722_v40 = vld [vmem:[%s5991_s1 + $0x8] sm:$0xff] }
   0x5   :  { %v737_v3 = vsel %vm735_vm0, %v721_v2, 0  ;;  %v63_v11 = vunpack.c.l.s4 %v5388_v10  ;;  %v5455_v13 = vshrl.u32 %v26_v9, 7  ;;  %v5457_v14 = vand.u32 127, %v26_v9 }
   0x6   :  { %38 = vrot.lane.b32.xlu1 %v5383_v1, %s5381_s20  ;;  %32 = vrot.lane.b32.xlu0 %v5383_v1, %s5382_s21  ;;  %v5438_v4 = vand.u32 4294901760, %v737_v3  ;;  %vm658_vm5 = vcmask 1040384   ;;  %v740_v53 = vsel %vm735_vm0, %v722_v40, 0  ;;  %vm667_vm6 = vcmask 1041408  }
   0x7   :  { %v64_v12 = vunpack.c.0.s8 %v63_v11  ;;  %vm40_vm1 = vcmp.lt.s32.totalorder %v5457_v14, 1  ;;  %vm34_vm2 = vcmp.lt.s32.totalorder %v5457_v14, 2  ;;  %vm28_vm3 = vcmp.lt.s32.totalorder %v5457_v14, 3 }
   0x8   :  { %v5441_v5 = vsub.f32 %v737_v3, %v5438_v4  ;;  %v5485_v38 = vsub.s32 0, %v5455_v13  ;;  %vm46_vm4 = vcmp.lt.s32.totalorder %v5457_v14, 127  ;;  %vm52_vm7 = vcmp.lt.s32.totalorder %v5457_v14, 126 }
   0x9   :  { %v5462_v18 = vsub.s32 %v64_v12, %v5455_v13  ;;  %vm676_vm8 = vcmask 1042432   ;;  %vm685_vm9 = vcmask 1043456   ;;  %vm58_vm10 = vcmp.lt.s32.totalorder %v5457_v14, 125 }
   0xa   :  { %24 = vrot.lane.b32.xlu1 %v5383_v1, %s5384_s22  ;;  %22 = vrot.lane.b32.xlu0 %v5426_v0, %s5384_s22  ;;  %v5444_v6 = vand.u32 4294901760, %v5441_v5  ;;  %vm694_vm11 = vcmask 1044480   ;;  %vm703_vm12 = vcmask 1045504   ;;  %vm712_vm13 = vcmask 1046528  }
   0xb   :  { %v233_v19 = vrot.slane %v219_v15, %v5462_v18  ;;  %v226_v22 = vrot.slane %v5426_v0, %v5462_v18 }
   0xc   :  { %v811_v7 = vsub.f32 %v5441_v5, %v5444_v6 }
   0xd   :  { %v235_v27 = vcombine.high %v233_v19, %v233_v19  ;;  %v234_v28 = vcombine.high %v226_v22, %v226_v22  ;;  %v5472_v33 = vrot.slane %v233_v19, %v5462_v18  ;;  %v5479_v35 = vrot.slane %v226_v22, %v5462_v18 }
   0xe   :  { %44 = vrot.lane.b32.xlu1 %v5383_v1, %s5385_s23  ;;  %42 = vrot.lane.b32.xlu0 %v5426_v0, %s5385_s23  ;;  %v5448_v8 = vand.u32 4294901760, %v811_v7 }
   0xf   :  { %v5475_v34 = vrot.slane %v235_v27, %v5462_v18  ;;  %v5482_v36 = vrot.slane %v234_v28, %v5462_v18  ;;  %v265_v45 = vcombine.high %v5472_v33, %v5472_v33  ;;  %v501_v48 = vrot.slane %v5479_v35, %v5485_v38 }
  0x10   :  { %5006 = vmatprep.mubr.f32.mxu0 %v5448_v8  ;;  %5036 = vmatprep.mubr.f32.mxu1 %v5448_v8  ;;  %v517_v52 = vrot.slane %v5472_v33, %v5485_v38 }
  0x11   :  { %v267_v46 = vcombine.high %v5475_v34, %v5475_v34  ;;  %v505_v49 = vrot.slane %v5482_v36, %v5485_v38  ;;  %v521_v57 = vrot.slane %v5475_v34, %v5485_v38  ;;  %v5512_v60 = vrot.slane %v265_v45, %v5485_v38 }
  0x12   :  { %50 = vrot.lane.b32.xlu1 %v5383_v1, %s5386_s0  ;;  %48 = vrot.lane.b32.xlu0 %v5426_v0, %s5386_s0 }
  0x13   :  { %v5515_v61 = vrot.slane %v267_v46, %v5485_v38 }
  0x16   :  { %56 = vrot.lane.b32.xlu1 %v5383_v1, %s5387_s24  ;;  %54 = vrot.lane.b32.xlu0 %v5426_v0, %s5387_s24  ;;  %v5519_v1 = vand.u32 4294901760, %v740_v53 }
  0x35   :  { %4670 = vadd.xlane.f32.xlu0 %v5426_v0 }
  0x39   :  { %4687 = vmax.xlane.f32.xlu0 %v5426_v0 }
  0x3d   :  { %4689 = vmin.xlane.f32.xlu0 %v5426_v0 }
  0x74   :  { %v37_v16 = vpop.permute.xlu1 %36  ;;  %v31_v17 = vpop.permute.xlu0 %30 }
  0x78   :  { %v39_v20 = vpop.permute.xlu1 %38  ;;  %v33_v21 = vpop.permute.xlu0 %32 }
  0x79   :  { %v41_v23 = vsel %vm40_vm1, %v39_v20, %v37_v16  ;;  %v35_v24 = vsel %vm34_vm2, %v33_v21, %v31_v17 }
  0x7a   :  { %v169_v25 = vcombine.high %v41_v23, %v41_v23  ;;  %v119_v26 = vcombine.high %v35_v24, %v35_v24  ;;  %v126_v50 = vrot.slane %v35_v24, %v5462_v18  ;;  %v176_v2 = vrot.slane %v41_v23, %v5462_v18 }
  0x7c   :  { %v133_v29 = vrot.slane %v119_v26, %v5462_v18  ;;  %v25_v30 = vpop.permute.xlu1 %24  ;;  %v23_v31 = vpop.permute.xlu0 %22  ;;  %v183_v32 = vrot.slane %v169_v25, %v5462_v18  ;;  %v134_v3 = vcombine.high %v126_v50, %v126_v50 }
  0x7d   :  { %v29_v42 = vsel %vm28_vm3, %v25_v30, %v23_v31 }
  0x7e   :  { %v135_v37 = vcombine.high %v133_v29, %v133_v29  ;;  %v185_v39 = vcombine.high %v183_v32, %v183_v32  ;;  %v199_v41 = vrot.slane %v183_v32, %v5462_v18  ;;  %v149_v47 = vrot.slane %v133_v29, %v5462_v18 }
  0x7f   :  { %v61_v55 = vcombine.high %v29_v42, %v29_v42  ;;  %v68_v31 = vrot.slane %v29_v42, %v5462_v18 }
  0x80   :  { %v45_v43 = vpop.permute.xlu1 %44  ;;  %v43_v44 = vpop.permute.xlu0 %42  ;;  %v163_v51 = vrot.slane %v135_v37, %v5462_v18  ;;  %v213_v54 = vrot.slane %v185_v39, %v5462_v18  ;;  %v215_v58 = vcombine.high %v199_v41, %v199_v41  ;;  %v165_v62 = vcombine.high %v149_v47, %v149_v47 }
  0x81   :  { %v47_v56 = vsel %vm46_vm4, %v43_v44, %v45_v43  ;;  %v75_v63 = vrot.slane %v61_v55, %v5462_v18  ;;  %v477_v11 = vrot.slane %v199_v41, %v5485_v38  ;;  %v437_v21 = vrot.slane %v149_v47, %v5485_v38 }
  0x82   :  { %v269_v59 = vcombine.high %v47_v56, %v47_v56  ;;  %v167_v7 = vcombine.high %v163_v51, %v163_v51  ;;  %v217_v10 = vcombine.high %v213_v54, %v213_v54  ;;  %v481_v19 = vrot.slane %v213_v54, %v5485_v38 }
  0x83   :  { %v77_v12 = vcombine.high %v75_v63, %v75_v63  ;;  %v91_v15 = vrot.slane %v75_v63, %v5462_v18  ;;  %v485_v20 = vrot.slane %v215_v58, %v5485_v38  ;;  %v441_v22 = vrot.slane %v163_v51, %v5485_v38 }
  0x84   :  { %v283_v9 = vrot.slane %v269_v59, %v5462_v18  ;;  %v51_v16 = vpop.permute.xlu1 %50  ;;  %v49_v17 = vpop.permute.xlu0 %48  ;;  %v445_v23 = vrot.slane %v165_v62, %v5485_v38  ;;  %v449_v27 = vrot.slane %v167_v7, %v5485_v38  ;;  %v489_v40 = vrot.slane %v217_v10, %v5485_v38 }
  0x85   :  { %v105_v24 = vrot.slane %v77_v12, %v5462_v18  ;;  %v107_v25 = vcombine.high %v91_v15, %v91_v15  ;;  %v663_v28 = vsel %vm658_vm5, %v91_v15, %v437_v21  ;;  %v53_v30 = vsel %vm52_vm7, %v49_v17, %v51_v16 }
  0x86   :  { %v285_v26 = vcombine.high %v283_v9, %v283_v9  ;;  %v299_v29 = vrot.slane %v283_v9, %v5462_v18  ;;  %v672_v41 = vsel %vm667_vm6, %v663_v28, %v477_v11  ;;  %v5544_v44 = vsub.f32 %v740_v53, %v5519_v1 }
  0x87   :  { %v109_v32 = vcombine.high %v105_v24, %v105_v24  ;;  %v664_v37 = vsel %vm658_vm5, %v105_v24, %v441_v22  ;;  %v665_v39 = vsel %vm658_vm5, %v107_v25, %v445_v23  ;;  %v319_v47 = vcombine.high %v53_v30, %v53_v30 }
  0x88   :  { %v673_v43 = vsel %vm667_vm6, %v664_v37, %v481_v19  ;;  %v674_v42 = vsel %vm667_vm6, %v665_v39, %v485_v20  ;;  %v313_v46 = vrot.slane %v285_v26, %v5462_v18  ;;  %v184_v51 = vcombine.high %v176_v2, %v176_v2  ;;  %v55_v21 = vpop.permute.xlu0 %54 }
  0x89   :  { %v666_v45 = vsel %vm658_vm5, %v109_v32, %v449_v27  ;;  %v5550_v54 = vrot.slane %v176_v2, %v5462_v18  ;;  %v315_v58 = vcombine.high %v299_v29, %v299_v29  ;;  %v5554_v59 = vrot.slane %v126_v50, %v5462_v18 }
  0x8a   :  { %v675_v55 = vsel %vm667_vm6, %v666_v45, %v489_v40  ;;  %v5557_v53 = vrot.slane %v134_v3, %v5462_v18  ;;  %v76_v62 = vcombine.high %v68_v31, %v68_v31  ;;  %v317_v63 = vcombine.high %v313_v46, %v313_v46 }
  0x8b   :  { %v276_v7 = vrot.slane %v47_v56, %v5462_v18  ;;  %v557_v9 = vrot.slane %v299_v29, %v5485_v38  ;;  %v561_v10 = vrot.slane %v313_v46, %v5485_v38  ;;  %v565_v2 = vrot.slane %v315_v58, %v5485_v38 }
  0x8c   :  { %v5564_v11 = vrot.slane %v68_v31, %v5462_v18  ;;  %v569_v12 = vrot.slane %v317_v63, %v5485_v38  ;;  %v326_v50 = vrot.slane %v53_v30, %v5462_v18  ;;  %v333_v3 = vrot.slane %v319_v47, %v5462_v18 }
  0x8d   :  { %v681_v56 = vsel %vm676_vm8, %v672_v41, %v517_v52  ;;  %v682_v15 = vsel %vm676_vm8, %v673_v43, %v521_v57  ;;  %v683_v16 = vsel %vm676_vm8, %v674_v42, %v5512_v60  ;;  %v684_v17 = vsel %vm676_vm8, %v675_v55, %v5515_v61  ;;  %v57_v52 = vpop.permute.xlu1 %56 }
  0x8e   :  { %v5582_v19 = vrot.slane %v184_v51, %v5462_v18  ;;  %v421_v20 = vrot.slane %v5554_v59, %v5485_v38  ;;  %v5587_v33 = vrot.slane %v76_v62, %v5462_v18  ;;  %v5590_v34 = vand.u32 4294901760, %v5544_v44 }
  0x8f   :  { %v690_v57 = vsel %vm685_vm9, %v681_v56, %v557_v9  ;;  %v691_v60 = vsel %vm685_vm9, %v682_v15, %v561_v10  ;;  %v692_v61 = vsel %vm685_vm9, %v683_v16, %v565_v2  ;;  %v693_v22 = vsel %vm685_vm9, %v684_v17, %v569_v12 }
  0x90   :  { %v461_v23 = vrot.slane %v5550_v54, %v5485_v38  ;;  %v284_v24 = vcombine.high %v276_v7, %v276_v7  ;;  %v335_v25 = vcombine.high %v333_v3, %v333_v3  ;;  %v349_v26 = vrot.slane %v333_v3, %v5462_v18 }
  0x91   :  { %v425_v27 = vrot.slane %v5557_v53, %v5485_v38  ;;  %v659_v28 = vsel %vm658_vm5, %v5564_v11, %v421_v20  ;;  %v334_v29 = vcombine.high %v326_v50, %v326_v50  ;;  %v59_v30 = vsel %vm58_vm10, %v55_v21, %v57_v52 }
  0x92   :  { %v5606_v31 = vrot.slane %v276_v7, %v5462_v18  ;;  %v5609_v32 = vrot.slane %v326_v50, %v5462_v18  ;;  %v363_v37 = vrot.slane %v335_v25, %v5462_v18  ;;  %v365_v39 = vcombine.high %v349_v26, %v349_v26 }
  0x93   :  { %v660_v40 = vsel %vm658_vm5, %v5587_v33, %v425_v27  ;;  %v597_v41 = vrot.slane %v349_v26, %v5485_v38  ;;  %v369_v43 = vcombine.high %v59_v30, %v59_v30  ;;  %v376_v45 = vrot.slane %v59_v30, %v5462_v18 }
  0x94   :  { %v465_v14 = vrot.slane %v5582_v19, %v5485_v38  ;;  %v668_v42 = vsel %vm667_vm6, %v659_v28, %v461_v23  ;;  %v5620_v46 = vrot.slane %v284_v24, %v5462_v18  ;;  %v367_v47 = vcombine.high %v363_v37, %v363_v37 }
  0x95   :  { %v5623_v51 = vrot.slane %v334_v29, %v5462_v18  ;;  %v601_v55 = vrot.slane %v363_v37, %v5485_v38  ;;  %v605_v58 = vrot.slane %v365_v39, %v5485_v38  ;;  %v699_v62 = vsel %vm694_vm11, %v690_v57, %v597_v41 }
  0x96   :  { %v669_v63 = vsel %vm667_vm6, %v660_v40, %v465_v14  ;;  %v541_v7 = vrot.slane %v5606_v31, %v5485_v38  ;;  %v581_v9 = vrot.slane %v5609_v32, %v5485_v38  ;;  %v609_v10 = vrot.slane %v367_v47, %v5485_v38 }
  0x97   :  { %v700_v2 = vsel %vm694_vm11, %v691_v60, %v601_v55  ;;  %v701_v12 = vsel %vm694_vm11, %v692_v61, %v605_v58  ;;  %v383_v50 = vrot.slane %v369_v43, %v5462_v18  ;;  %v384_v3 = vcombine.high %v376_v45, %v376_v45 }
  0x98   :  { %v545_v56 = vrot.slane %v5620_v46, %v5485_v38  ;;  %v677_v15 = vsel %vm676_vm8, %v668_v42, %v501_v48  ;;  %v702_v16 = vsel %vm694_vm11, %v693_v22, %v609_v10  ;;  %v5645_v17 = vrot.slane %v376_v45, %v5462_v18 }
  0x99   :  { %v585_v20 = vrot.slane %v5623_v51, %v5485_v38  ;;  %v385_v52 = vcombine.high %v383_v50, %v383_v50  ;;  %v399_v21 = vrot.slane %v383_v50, %v5462_v18  ;;  %v5651_v57 = vrot.slane %v384_v3, %v5462_v18  ;;  %v724_v50 = vld [vmem:[%s5992_s2 + $0x8] sm:$0xff] }
  0x9a   :  { %v678_v60 = vsel %vm676_vm8, %v669_v63, %v505_v49  ;;  %v686_v48 = vsel %vm685_vm9, %v677_v15, %v541_v7  ;;  %v621_v61 = vrot.slane %v5645_v17, %v5485_v38  ;;  %v821_v28 = vsub.f32 %v5544_v44, %v5590_v34 }
  0x9b   :  { %v695_v22 = vsel %vm694_vm11, %v686_v48, %v581_v9  ;;  %v413_v23 = vrot.slane %v385_v52, %v5462_v18  ;;  %v415_v24 = vcombine.high %v399_v21, %v399_v21  ;;  %v625_v25 = vrot.slane %v5651_v57, %v5485_v38 }
  0x9c   :  { %v687_v26 = vsel %vm685_vm9, %v678_v60, %v545_v56  ;;  %v637_v27 = vrot.slane %v399_v21, %v5485_v38  ;;  %v704_v49 = vsel %vm703_vm12, %v695_v22, %v621_v61  ;;  %v5682_v55 = vand.u32 4294901760, %v821_v28 }
  0x9d   :  { %v696_v29 = vsel %vm694_vm11, %v687_v26, %v585_v20  ;;  %v417_v30 = vcombine.high %v413_v23, %v413_v23  ;;  %v641_v37 = vrot.slane %v413_v23, %v5485_v38  ;;  %v645_v18 = vrot.slane %v415_v24, %v5485_v38 }
  0x9e   :  { %v705_v39 = vsel %vm703_vm12, %v696_v29, %v625_v25  ;;  %v708_v40 = vsel %vm703_vm12, %v699_v62, %v637_v27  ;;  %v713_v41 = vsel %vm712_vm13, %v704_v49, 0.0  ;;  %v5389_v15 = vmov 0  }
  0x9f   :  { %v649_v43 = vrot.slane %v417_v30, %v5485_v38  ;;  %v709_v45 = vsel %vm703_vm12, %v700_v2, %v641_v37  ;;  %v710_v14 = vsel %vm703_vm12, %v701_v12, %v645_v18  ;;  %v714_v42 = vsel %vm712_vm13, %v705_v39, 0.0  ;;  %5353 = vset.pattern.permute.xlu0 %v5389_v15  ;;  %5352 = vset.pattern.permute.xlu1 %v5389_v15 }
  0xa0   :  { %v5680_v47 = vsel %vm712_vm13, %v708_v40, 0.0  ;;  %v5686_v63 = vsel %vm712_vm13, %v709_v45, 0.0  ;;  %v5689_v62 = vsel %vm712_vm13, %v710_v14, 0.0  ;;  %v5691_v7 = vand.u32 4294901760, %v713_v41  ;;  %732 = vperm.xlu0 %5353, %v724_v50  }
  0xa1   :  { %v711_v58 = vsel %vm703_vm12, %v702_v16, %v649_v43  ;;  %v5696_v10 = vand.u32 4294901760, %v714_v42  ;;  %v164_v52 = vcombine.high %v5554_v59, %v5554_v59  ;;  %v214_v21 = vcombine.high %v5550_v54, %v5550_v54 }
  0xa2   :  { %v5694_v9 = vsel %vm712_vm13, %v711_v58, 0.0  ;;  %5004 = vmatprep.subr.mxu0 %v5691_v7  ;;  %v830_v2 = vsub.f32 %v713_v41, %v5691_v7  ;;  %v166_v60 = vcombine.high %v5557_v53, %v5557_v53  ;;  %v106_v22 = vcombine.high %v5564_v11, %v5564_v11 }
  0xa3   :  { %5005 = vmatpush3.msra.mxu0 %v5691_v7  ;;  %5034 = vmatprep.subr.mxu1 %v5696_v10  ;;  %v1319_v12 = vsub.f32 %v714_v42, %v5696_v10  ;;  %v108_v23 = vcombine.high %v5587_v33, %v5587_v33  ;;  %v264_v24 = vcombine.high %v5479_v35, %v5479_v35 }
  0xa4   :  { %5007 = vmatmul.mubr.f32.vlgmr.msra.gmra.mrb[0].mxu0 %v5682_v55  ;;  %5035 = vmatpush3.msra.mxu1 %v5696_v10  ;;  %v5709_v3 = vand.u32 4294901760, %v830_v2  ;;  %v216_v59 = vcombine.high %v5582_v19, %v5582_v19  ;;  %v429_v54 = vrot.slane %v164_v52, %v5485_v38  ;;  %v266_v53 = vcombine.high %v5482_v36, %v5482_v36 }
  0xa5   :  { %5037 = vmatmul.mubr.f32.vlgmr.msra.gmra.mrb[0].mxu1 %v5682_v55  ;;  %5011 = vmatprep.mubr.f32.mxu0 %v5438_v4  ;;  %v5712_v56 = vand.u32 4294901760, %v1319_v12  ;;  %v469_v11 = vrot.slane %v214_v21, %v5485_v38  ;;  %v433_v25 = vrot.slane %v166_v60, %v5485_v38  ;;  %v314_v33 = vcombine.high %v5606_v31, %v5606_v31 }
  0xa6   :  { %5041 = vmatprep.mubr.f32.mxu1 %v5438_v4  ;;  %v832_v16 = vsub.f32 %v830_v2, %v5709_v3  ;;  %v661_v35 = vsel %vm658_vm5, %v106_v22, %v429_v54  ;;  %v316_v19 = vcombine.high %v5620_v46, %v5620_v46  ;;  %v364_v36 = vcombine.high %v5609_v32, %v5609_v32 }
  0xa7   :  { %v1321_v20 = vsub.f32 %v1319_v12, %v5712_v56  ;;  %v662_v26 = vsel %vm658_vm5, %v108_v23, %v433_v25  ;;  %v366_v27 = vcombine.high %v5623_v51, %v5623_v51  ;;  %v414_v31 = vcombine.high %v5645_v17, %v5645_v17 }
  0xa8   :  { %v833_v48 = vand.u32 4294901760, %v832_v16  ;;  %v473_v49 = vrot.slane %v216_v59, %v5485_v38  ;;  %v509_v46 = vrot.slane %v264_v24, %v5485_v38  ;;  %v416_v32 = vcombine.high %v5651_v57, %v5651_v57 }
  0xa9   :  { %v1322_v61 = vand.u32 4294901760, %v1321_v20  ;;  %v670_v28 = vsel %vm667_vm6, %v661_v35, %v469_v11  ;;  %v513_v51 = vrot.slane %v266_v53, %v5485_v38  ;;  %v549_v29 = vrot.slane %v314_v33, %v5485_v38 }
  0xaa   :  { %5009 = vmatprep.subr.mxu0 %v833_v48  ;;  %v671_v17 = vsel %vm667_vm6, %v662_v26, %v473_v49  ;;  %v553_v30 = vrot.slane %v316_v19, %v5485_v38  ;;  %v589_v37 = vrot.slane %v364_v36, %v5485_v38  ;;  %v593_v57 = vrot.slane %v366_v27, %v5485_v38 }
  0xab   :  { %5039 = vmatprep.subr.mxu1 %v1322_v61  ;;  %5010 = vmatpush3.msra.mxu0 %v833_v48  ;;  %v629_v18 = vrot.slane %v414_v31, %v5485_v38  ;;  %v679_v39 = vsel %vm676_vm8, %v670_v28, %v509_v46  ;;  %v633_v40 = vrot.slane %v416_v32, %v5485_v38  ;;  %v5837_v24 = vand.u32 4294901760, %v5680_v47 }
  0xac   :  { %5040 = vmatpush3.msra.mxu1 %v1322_v61  ;;  %5012 = vmatmul.mubr.f32.vlgmr.msra.gmra.mrb[0].mxu0 %v5519_v1  ;;  %v680_v41 = vsel %vm676_vm8, %v671_v17, %v513_v51  ;;  %v688_v43 = vsel %vm685_vm9, %v679_v39, %v549_v29  ;;  %v5841_v59 = vand.u32 4294901760, %v5686_v63  ;;  %v5883_v19 = vand.u32 4294901760, %v5689_v62 }
  0xad   :  { %5014 = vmatprep.subr.mxu0 %v830_v2  ;;  %5042 = vmatmul.mubr.f32.vlgmr.msra.gmra.mrb[0].mxu1 %v5519_v1  ;;  %v689_v45 = vsel %vm685_vm9, %v680_v41, %v553_v30  ;;  %v697_v14 = vsel %vm694_vm11, %v688_v43, %v589_v37  ;;  %v2786_v54 = vsub.f32 %v5680_v47, %v5837_v24  ;;  %v5887_v36 = vand.u32 4294901760, %v5694_v9 }
  0xae   :  { %5015 = vmatpush3.msra.mxu0 %v830_v2  ;;  %5044 = vmatprep.subr.mxu1 %v1319_v12  ;;  %v698_v42 = vsel %vm694_vm11, %v689_v45, %v593_v57  ;;  %v706_v58 = vsel %vm703_vm12, %v697_v14, %v629_v18  ;;  %v3275_v53 = vsub.f32 %v5686_v63, %v5841_v59  ;;  %v4711_v28 = vsub.s32 3, %v5455_v13 }
  0xaf   :  { %5019 = vmatprep.subr.mxu0 %v5691_v7  ;;  %5045 = vmatpush3.msra.mxu1 %v1319_v12  ;;  %v707_v2 = vsel %vm703_vm12, %v698_v42, %v633_v40  ;;  %v715_v50 = vsel %vm712_vm13, %v706_v58, 0.0  ;;  %v2787_v11 = vand.u32 4294901760, %v2786_v54  ;;  %v3764_v26 = vsub.f32 %v5689_v62, %v5883_v19  ;;  %v4859_v58 = vld [vmem:[%s5994_s4] ss:$0 sm:$0xff]  ;;  %s5390_s4 = smov [#allocation2]  }
  0xb0   :  { %5016 = vmatprep.mubr.f32.mxu0 %v5441_v5  ;;  %5049 = vmatprep.subr.mxu1 %v5696_v10  ;;  %v716_v16 = vsel %vm712_vm13, %v707_v2, 0.0  ;;  %v5789_v52 = vand.u32 4294901760, %v715_v50  ;;  %v3276_v25 = vand.u32 4294901760, %v3275_v53  ;;  %v4253_v27 = vsub.f32 %v5694_v9, %v5887_v36  ;;  %s4848_s9 = sshll.u32 %s5390_s4, 4  ;;  %s4849_s9 = int_to_ptr.vmem [resolvable:$true] %s4848_s9 }
  0xb1   :  { %5046 = vmatprep.mubr.f32.mxu1 %v5441_v5  ;;  %v5792_v21 = vand.u32 4294901760, %v716_v16  ;;  %v2788_v47 = vsub.f32 %v2786_v54, %v2787_v11  ;;  %v3765_v31 = vand.u32 4294901760, %v3764_v26  ;;  %s5357_s10 = scalar_lea.vmem %s4849_s9, 2048  ;;  %p5362_p1 = scmp.lt.s32.totalorder %s4849_s9, %s4849_s9 }
  0xb2   :  { %v3277_v63 = vsub.f32 %v3275_v53, %v3276_v25  ;;  %v4254_v49 = vand.u32 4294901760, %v4253_v27  ;;  %p5358_p0 = scmp.ne.s32.totalorder %s4849_s9, %s5357_s10  ;;  %p5363_p2 = scmp.lt.s32.totalorder %s5357_s10, %s5357_s10 }
  0xb3   :  { %v2297_v48 = vsub.f32 %v716_v16, %v5792_v21  ;;  %v2789_v33 = vand.u32 4294901760, %v2788_v47  ;;  %v3766_v62 = vsub.f32 %v3764_v26, %v3765_v31 }
  0xb4   :  { %5017 = vmatmul.mubr.f32.vlgmr.msra.gmra.mrb[0].mxu0 %v5544_v44  ;;  %v3278_v35 = vand.u32 4294901760, %v3277_v63  ;;  %v4255_v9 = vsub.f32 %v4253_v27, %v4254_v49  ;;  %p5364_p3 = por %p5363_p2, %p5362_p1 }
  0xb5   :  { %5020 = vmatpush3.msra.mxu0 %v5691_v7  ;;  %5047 = vmatmul.mubr.f32.vlgmr.msra.gmra.mrb[0].mxu1 %v5544_v44  ;;  %v2298_v61 = vand.u32 4294901760, %v2297_v48  ;;  %v3767_v46 = vand.u32 4294901760, %v3766_v62 }
  0xb6   :  { %5024 = vmatprep.subr.mxu0 %v5709_v3  ;;  %5050 = vmatpush3.msra.mxu1 %v5696_v10  ;;  %v4256_v32 = vand.u32 4294901760, %v4255_v9  ;;  %p5365_p4 = pnand %p5364_p3, %p5358_p0 }
  0xb7   :  { %5054 = vmatprep.subr.mxu1 %v5712_v56  ;;  %5021 = vmatprep.mubr.f32.mxu0 %v5444_v6  ;;  %v2299_v22 = vsub.f32 %v2297_v48, %v2298_v61 }
  0xb8   :  { %5051 = vmatprep.mubr.f32.mxu1 %v5444_v6 }
  0xbc   :  { %5022 = vmatmul.mubr.f32.vlgmr.msra.gmra.mrb[0].mxu0 %v5590_v34 }
  0xbd   :  { %5025 = vmatpush3.msra.mxu0 %v5709_v3  ;;  %5052 = vmatmul.mubr.f32.vlgmr.msra.gmra.mrb[0].mxu1 %v5590_v34 }
  0xbe   :  { %5029 = vmatprep.subr.mxu0 %v5691_v7  ;;  %5055 = vmatpush3.msra.mxu1 %v5712_v56 }
  0xbf   :  { %5059 = vmatprep.subr.mxu1 %v5696_v10  ;;  %5026 = vmatprep.mubr.f32.mxu0 %v5438_v4 }
  0xc0   :  { %5056 = vmatprep.mubr.f32.mxu1 %v5438_v4 }
  0xc2   :  { %v4671_v12 = vpop.xlane.xlu0 %4670 }
  0xc3   :  { %v5784_v15 = vmul.f32 0.0078125, %v4671_v12  ;;  %v4769_v12 = vsub.s32 4, %v5455_v13 }
  0xc4   :  { %5027 = vmatmul.mubr.f32.vlgmr.msra.gmra.mrb[0].mxu0 %v5519_v1 }
  0xc5   :  { %v4674_v20 = vsub.f32 %v5426_v0, %v5784_v15  ;;  %v1808_v0 = vsub.f32 %v715_v50, %v5789_v52  ;;  %5030 = vmatpush3.msra.mxu0 %v5691_v7  ;;  %5057 = vmatmul.mubr.f32.vlgmr.msra.gmra.mrb[0].mxu1 %v5519_v1  ;;  %v2300_v7 = vand.u32 4294901760, %v2299_v22 }
  0xc6   :  { %5064 = vmatprep.subr.mxu0 %v5789_v52  ;;  %5060 = vmatpush3.msra.mxu1 %v5696_v10  ;;  %v723_v10 = vld [vmem:[%s5992_s2] sm:$0xff] }
  0xc7   :  { %v4675_v60 = vmul.f32 %v4674_v20, %v4674_v20  ;;  %v1809_v3 = vand.u32 4294901760, %v1808_v0  ;;  %5094 = vmatprep.subr.mxu1 %v5792_v21  ;;  %5031 = vmatprep.mubr.f32.mxu0 %v5438_v4 }
  0xc8   :  { %5061 = vmatprep.mubr.f32.mxu1 %v5438_v4 }
  0xc9   :  { %4676 = vadd.xlane.f32.xlu1 %v4675_v60  ;;  %v1810_v56 = vsub.f32 %v1808_v0, %v1809_v3 }
  0xcb   :  { %v1811_v23 = vand.u32 4294901760, %v1810_v56 }
  0xcc   :  { %5032 = vmatmul.mubr.f32.vlgmr.msra.gmra.mrb[0].mxu0 %v5519_v1 }
  0xcd   :  { %5065 = vmatpush3.msra.mxu0 %v5789_v52  ;;  %5062 = vmatmul.mubr.f32.vlgmr.msra.gmra.mrb[0].mxu1 %v5519_v1 }
  0xce   :  { %5069 = vmatprep.subr.mxu0 %v1811_v23  ;;  %5095 = vmatpush3.msra.mxu1 %v5792_v21 }
  0xcf   :  { %5066 = vmatprep.mubr.f32.mxu0 %v5448_v8  ;;  %5099 = vmatprep.subr.mxu1 %v2300_v7 }
  0xd0   :  { %5067 = vmatmul.mubr.f32.vlgmr.msra.gmra.mrb[2].mxu0 %v5682_v55  ;;  %5096 = vmatprep.mubr.f32.mxu1 %v5448_v8 }
  0xd1   :  { %5070 = vmatpush3.msra.mxu0 %v1811_v23  ;;  %5097 = vmatmul.mubr.f32.vlgmr.msra.gmra.mrb[2].mxu1 %v5682_v55 }
  0xd2   :  { %5074 = vmatprep.subr.mxu0 %v1808_v0  ;;  %5100 = vmatpush3.msra.mxu1 %v2300_v7 }
  0xd3   :  { %5104 = vmatprep.subr.mxu1 %v2297_v48  ;;  %5071 = vmatprep.mubr.f32.mxu0 %v5438_v4 }
  0xd4   :  { %5101 = vmatprep.mubr.f32.mxu1 %v5438_v4 }
  0xd8   :  { %5072 = vmatmul.mubr.f32.vlgmr.msra.gmra.mrb[2].mxu0 %v5519_v1 }
  0xd9   :  { %5075 = vmatpush3.msra.mxu0 %v1808_v0  ;;  %5102 = vmatmul.mubr.f32.vlgmr.msra.gmra.mrb[2].mxu1 %v5519_v1 }
  0xda   :  { %727 = vperm.xlu1 %5352, %v723_v10   ;;  %5079 = vmatprep.subr.mxu0 %v5789_v52 }
  0xdb   :  { %5105 = vmatpush3.msra.mxu1 %v2297_v48  ;;  %5076 = vmatprep.mubr.f32.mxu0 %v5441_v5  ;;  %v4802_v48 = vsub.s32 7, %v5455_v13 }
  0xdc   :  { %5109 = vmatprep.subr.mxu1 %v5792_v21  ;;  %5106 = vmatprep.mubr.f32.mxu1 %v5441_v5 }
  0xe0   :  { %5077 = vmatmul.mubr.f32.vlgmr.msra.gmra.mrb[2].mxu0 %v5544_v44 }
  0xe1   :  { %5080 = vmatpush3.msra.mxu0 %v5789_v52  ;;  %5107 = vmatmul.mubr.f32.vlgmr.msra.gmra.mrb[2].mxu1 %v5544_v44 }
  0xe2   :  { %5084 = vmatprep.subr.mxu0 %v1809_v3  ;;  %5110 = vmatpush3.msra.mxu1 %v5792_v21 }
  0xe3   :  { %5114 = vmatprep.subr.mxu1 %v2298_v61  ;;  %5081 = vmatprep.mubr.f32.mxu0 %v5444_v6 }
  0xe4   :  { %5111 = vmatprep.mubr.f32.mxu1 %v5444_v6 }
  0xe8   :  { %5082 = vmatmul.mubr.f32.vlgmr.msra.gmra.mrb[2].mxu0 %v5590_v34 }
  0xe9   :  { %5085 = vmatpush3.msra.mxu0 %v1809_v3  ;;  %5112 = vmatmul.mubr.f32.vlgmr.msra.gmra.mrb[2].mxu1 %v5590_v34 }
  0xea   :  { %5089 = vmatprep.subr.mxu0 %v5789_v52  ;;  %5115 = vmatpush3.msra.mxu1 %v2298_v61 }
  0xeb   :  { %5119 = vmatprep.subr.mxu1 %v5792_v21  ;;  %5086 = vmatprep.mubr.f32.mxu0 %v5438_v4 }
  0xec   :  { %5116 = vmatprep.mubr.f32.mxu1 %v5438_v4 }
  0xf0   :  { %5087 = vmatmul.mubr.f32.vlgmr.msra.gmra.mrb[2].mxu0 %v5519_v1 }
  0xf1   :  { %5090 = vmatpush3.msra.mxu0 %v5789_v52  ;;  %5117 = vmatmul.mubr.f32.vlgmr.msra.gmra.mrb[2].mxu1 %v5519_v1  ;;  %v4780_v52 = vsub.s32 5, %v5455_v13 }
  0xf2   :  { %5124 = vmatprep.subr.mxu0 %v5837_v24  ;;  %5120 = vmatpush3.msra.mxu1 %v5792_v21  ;;  %v4791_v21 = vsub.s32 6, %v5455_v13 }
  0xf3   :  { %5154 = vmatprep.subr.mxu1 %v5841_v59  ;;  %5091 = vmatprep.mubr.f32.mxu0 %v5438_v4 }
  0xf4   :  { %5121 = vmatprep.mubr.f32.mxu1 %v5438_v4 }
  0xf8   :  { %5092 = vmatmul.mubr.f32.vlgmr.msra.gmra.mrb[2].mxu0 %v5519_v1 }
  0xf9   :  { %5125 = vmatpush3.msra.mxu0 %v5837_v24  ;;  %5122 = vmatmul.mubr.f32.vlgmr.msra.gmra.mrb[2].mxu1 %v5519_v1 }
  0xfa   :  { %5129 = vmatprep.subr.mxu0 %v2789_v33  ;;  %5155 = vmatpush3.msra.mxu1 %v5841_v59 }
  0xfb   :  { %5126 = vmatprep.mubr.f32.mxu0 %v5448_v8  ;;  %5159 = vmatprep.subr.mxu1 %v3278_v35 }
  0xfc   :  { %5127 = vmatmul.mubr.f32.vlgmr.msra.gmra.mrb[4].mxu0 %v5682_v55  ;;  %5156 = vmatprep.mubr.f32.mxu1 %v5448_v8 }
  0xfd   :  { %5130 = vmatpush3.msra.mxu0 %v2789_v33  ;;  %5157 = vmatmul.mubr.f32.vlgmr.msra.gmra.mrb[4].mxu1 %v5682_v55 }
  0xfe   :  { %5134 = vmatprep.subr.mxu0 %v2786_v54  ;;  %5160 = vmatpush3.msra.mxu1 %v3278_v35 }
  0xff   :  { %5164 = vmatprep.subr.mxu1 %v3275_v53  ;;  %5131 = vmatprep.mubr.f32.mxu0 %v5438_v4 }
 0x100   :  { %5161 = vmatprep.mubr.f32.mxu1 %v5438_v4 }
 0x104   :  { %5132 = vmatmul.mubr.f32.vlgmr.msra.gmra.mrb[4].mxu0 %v5519_v1 }
 0x105   :  { %5135 = vmatpush3.msra.mxu0 %v2786_v54  ;;  %5162 = vmatmul.mubr.f32.vlgmr.msra.gmra.mrb[4].mxu1 %v5519_v1 }
 0x106   :  { %5139 = vmatprep.subr.mxu0 %v5837_v24  ;;  %5165 = vmatpush3.msra.mxu1 %v3275_v53 }
 0x107   :  { %5169 = vmatprep.subr.mxu1 %v5841_v59  ;;  %5136 = vmatprep.mubr.f32.mxu0 %v5441_v5 }
 0x108   :  { %5166 = vmatprep.mubr.f32.mxu1 %v5441_v5 }
 0x10c   :  { %5137 = vmatmul.mubr.f32.vlgmr.msra.gmra.mrb[4].mxu0 %v5544_v44 }
 0x10d   :  { %5140 = vmatpush3.msra.mxu0 %v5837_v24  ;;  %5167 = vmatmul.mubr.f32.vlgmr.msra.gmra.mrb[4].mxu1 %v5544_v44 }
 0x10e   :  { %5144 = vmatprep.subr.mxu0 %v2787_v11  ;;  %5170 = vmatpush3.msra.mxu1 %v5841_v59 }
 0x10f   :  { %5174 = vmatprep.subr.mxu1 %v3276_v25  ;;  %5141 = vmatprep.mubr.f32.mxu0 %v5444_v6 }
 0x110   :  { %5171 = vmatprep.mubr.f32.mxu1 %v5444_v6 }
 0x114   :  { %5142 = vmatmul.mubr.f32.vlgmr.msra.gmra.mrb[4].mxu0 %v5590_v34 }
 0x115   :  { %5145 = vmatpush3.msra.mxu0 %v2787_v11  ;;  %5172 = vmatmul.mubr.f32.vlgmr.msra.gmra.mrb[4].mxu1 %v5590_v34 }
 0x116   :  { %5149 = vmatprep.subr.mxu0 %v5837_v24  ;;  %5175 = vmatpush3.msra.mxu1 %v3276_v25 }
 0x117   :  { %5179 = vmatprep.subr.mxu1 %v5841_v59  ;;  %5146 = vmatprep.mubr.f32.mxu0 %v5438_v4 }
 0x118   :  { %5176 = vmatprep.mubr.f32.mxu1 %v5438_v4 }
 0x11c   :  { %5147 = vmatmul.mubr.f32.vlgmr.msra.gmra.mrb[4].mxu0 %v5519_v1 }
 0x11d   :  { %5150 = vmatpush3.msra.mxu0 %v5837_v24  ;;  %5177 = vmatmul.mubr.f32.vlgmr.msra.gmra.mrb[4].mxu1 %v5519_v1 }
 0x11e   :  { %5184 = vmatprep.subr.mxu0 %v5883_v19  ;;  %5180 = vmatpush3.msra.mxu1 %v5841_v59 }
 0x11f   :  { %5214 = vmatprep.subr.mxu1 %v5887_v36  ;;  %5151 = vmatprep.mubr.f32.mxu0 %v5438_v4 }
 0x120   :  { %5181 = vmatprep.mubr.f32.mxu1 %v5438_v4 }
 0x124   :  { %5152 = vmatmul.mubr.f32.vlgmr.msra.gmra.mrb[4].mxu0 %v5519_v1 }
 0x125   :  { %5185 = vmatpush3.msra.mxu0 %v5883_v19  ;;  %5182 = vmatmul.mubr.f32.vlgmr.msra.gmra.mrb[4].mxu1 %v5519_v1 }
 0x126   :  { %5189 = vmatprep.subr.mxu0 %v3767_v46  ;;  %5215 = vmatpush3.msra.mxu1 %v5887_v36 }
 0x127   :  { %5186 = vmatprep.mubr.f32.mxu0 %v5448_v8  ;;  %5219 = vmatprep.subr.mxu1 %v4256_v32 }
 0x128   :  { %5187 = vmatmul.mubr.f32.vlgmr.msra.gmra.mrb[6].mxu0 %v5682_v55  ;;  %5216 = vmatprep.mubr.f32.mxu1 %v5448_v8  ;;  %v4699_v8 = vsub.s32 1, %v5455_v13 }
 0x129   :  { %5190 = vmatpush3.msra.mxu0 %v3767_v46  ;;  %5217 = vmatmul.mubr.f32.vlgmr.msra.gmra.mrb[6].mxu1 %v5682_v55  ;;  %v4688_v55 = vpop.xlane.xlu0 %4687 }
 0x12a   :  { %5194 = vmatprep.subr.mxu0 %v3764_v26  ;;  %5220 = vmatpush3.msra.mxu1 %v4256_v32 }
 0x12b   :  { %5224 = vmatprep.subr.mxu1 %v4253_v27  ;;  %5191 = vmatprep.mubr.f32.mxu0 %v5438_v4 }
 0x12c   :  { %5221 = vmatprep.mubr.f32.mxu1 %v5438_v4 }
 0x12d   :  { %v4690_v39 = vpop.xlane.xlu0 %4689 }
 0x130   :  { %5192 = vmatmul.mubr.f32.vlgmr.msra.gmra.mrb[6].mxu0 %v5519_v1 }
 0x131   :  { %5195 = vmatpush3.msra.mxu0 %v3764_v26  ;;  %5222 = vmatmul.mubr.f32.vlgmr.msra.gmra.mrb[6].mxu1 %v5519_v1  ;;  %v5961_v11 = vpop.permute.xlu0 %732 }
 0x132   :  { %5199 = vmatprep.subr.mxu0 %v5883_v19  ;;  %5225 = vmatpush3.msra.mxu1 %v4253_v27 }
 0x133   :  { %5229 = vmatprep.subr.mxu1 %v5887_v36  ;;  %5196 = vmatprep.mubr.f32.mxu0 %v5441_v5 }
 0x134   :  { %5226 = vmatprep.mubr.f32.mxu1 %v5441_v5 }
 0x138   :  { %5197 = vmatmul.mubr.f32.vlgmr.msra.gmra.mrb[6].mxu0 %v5544_v44 }
 0x139   :  { %5200 = vmatpush3.msra.mxu0 %v5883_v19  ;;  %5227 = vmatmul.mubr.f32.vlgmr.msra.gmra.mrb[6].mxu1 %v5544_v44  ;;  %v4705_v44 = vsub.s32 2, %v5455_v13 }
 0x13a   :  { %5204 = vmatprep.subr.mxu0 %v3765_v31  ;;  %5230 = vmatpush3.msra.mxu1 %v5887_v36 }
 0x13b   :  { %5234 = vmatprep.subr.mxu1 %v4254_v49  ;;  %5201 = vmatprep.mubr.f32.mxu0 %v5444_v6 }
 0x13c   :  { %5231 = vmatprep.mubr.f32.mxu1 %v5444_v6 }
 0x140   :  { %5202 = vmatmul.mubr.f32.vlgmr.msra.gmra.mrb[6].mxu0 %v5590_v34 }
 0x141   :  { %5205 = vmatpush3.msra.mxu0 %v3765_v31  ;;  %5232 = vmatmul.mubr.f32.vlgmr.msra.gmra.mrb[6].mxu1 %v5590_v34  ;;  %v4691_v34 = vld [vmem:[%s5993_s3] sm:$0xf] }
 0x142   :  { %5209 = vmatprep.subr.mxu0 %v5883_v19  ;;  %5235 = vmatpush3.msra.mxu1 %v4254_v49  ;;  %v4700_v17 = vrot.slane %v4691_v34, %v4699_v8  ;;  %v4706_v30 = vrot.slane %v4691_v34, %v4705_v44  ;;  %v4712_v57 = vrot.slane %v4691_v34, %v4711_v28 }
 0x143   :  { %5239 = vmatprep.subr.mxu1 %v5887_v36  ;;  %5206 = vmatprep.mubr.f32.mxu0 %v5438_v4 }
 0x144   :  { %5236 = vmatprep.mubr.f32.mxu1 %v5438_v4  ;;  %v4707_v43 = vmul.f32 %v4706_v30, %v4688_v55  ;;  %v4713_v14 = vmul.f32 %v4712_v57, %v4690_v39 }
 0x148   :  { %5207 = vmatmul.mubr.f32.vlgmr.msra.gmra.mrb[6].mxu0 %v5519_v1 }
 0x149   :  { %5210 = vmatpush3.msra.mxu0 %v5883_v19  ;;  %5237 = vmatmul.mubr.f32.vlgmr.msra.gmra.mrb[6].mxu1 %v5519_v1 }
 0x14a   :  { %5240 = vmatpush3.msra.mxu1 %v5887_v36  ;;  %5211 = vmatprep.mubr.f32.mxu0 %v5438_v4 }
 0x14b   :  { %5241 = vmatprep.mubr.f32.mxu1 %v5438_v4  ;;  %v4695_v4 = vrot.slane %v4691_v34, %v5485_v38 }
 0x14d   :  { %v4696_v40 = vmul.f32 %v4695_v4, %v5784_v15 }
 0x150   :  { %5212 = vmatmul.mubr.f32.vlgmr.msra.gmra.mrb[6].mxu0 %v5519_v1 }
 0x151   :  { %5242 = vmatmul.mubr.f32.vlgmr.msra.gmra.mrb[6].mxu1 %v5519_v1 }
 0x156   :  { %v4677_v5 = vpop.xlane.xlu1 %4676 }
 0x157   :  { %v4679_v6 = vmul.f32 0.007874016, %v4677_v5 }
 0x159   :  { %5355 = vrsqrt.f32 %v4679_v6  ;;  %vm4682_vm14 = vcmp.eq.f32.partialorder %v4679_v6, inf  ;;  %v4685_v37 = vand.u32 2147483648, %v4679_v6  ;;  %vm4684_vm15 = vcmp.eq.f32.partialorder %v4679_v6, 0.0 }
 0x15a   :  { %v5958_v54 = vpop.permute.xlu1 %727 }
 0x163   :  { %v5356_v51 = vpop.eup %5355 }
 0x164   :  { %v4681_v29 = vmul.f32 %v5356_v51, %v4679_v6 }
 0x166   :  { %v4683_v1 = vsel %vm4682_vm14, %v4679_v6, %v4681_v29 }
 0x167   :  { %v4686_v18 = vsel %vm4684_vm15, %v4685_v37, %v4683_v1 }
 0x168   :  { %v4701_v41 = vmul.f32 %v4700_v17, %v4686_v18 }
 0x16a   :  { %v4702_v45 = vadd.f32 %v4701_v41, %v4696_v40 }
 0x16c   :  { %v4708_v42 = vadd.f32 %v4707_v43, %v4702_v45 }
 0x16e   :  { %v4714_v2 = vadd.f32 %v4713_v14, %v4708_v42 }
 0x170   :  { %v4722_v50 = vadd.f32 %v4859_v58, %v4714_v2 }
 0x172   :  { %v4770_v16 = vrot.slane %v4722_v50, %v4769_v12  ;;  %v4726_v20 = vrot.slane %v4722_v50, %v5485_v38  ;;  %v4781_v15 = vrot.slane %v4722_v50, %v4780_v52  ;;  %v4792_v60 = vrot.slane %v4722_v50, %v4791_v21 }
 0x173   :  { %v4737_v0 = vrot.slane %v4722_v50, %v4699_v8  ;;  %v4803_v3 = vrot.slane %v4722_v50, %v4802_v48  ;;  %v4748_v61 = vrot.slane %v4722_v50, %v4705_v44  ;;  %v4759_v38 = vrot.slane %v4722_v50, %v4711_v28 }
 0x174   :  { %4772 = vbcast.lane.b32.xlu0 %v4770_v16, 256  ;;  %4728 = vbcast.lane.b32.xlu1 %v4726_v20, 256 }
 0x178   :  { %4783 = vbcast.lane.b32.xlu0 %v4781_v15, 256  ;;  %4732 = vbcast.lane.b32.xlu1 %v4726_v20, 264 }
 0x17c   :  { %4794 = vbcast.lane.b32.xlu0 %v4792_v60, 256  ;;  %4739 = vbcast.lane.b32.xlu1 %v4737_v0, 256 }
 0x180   :  { %4805 = vbcast.lane.b32.xlu0 %v4803_v3, 256  ;;  %4743 = vbcast.lane.b32.xlu1 %v4737_v0, 264 }
 0x184   :  { %4750 = vbcast.lane.b32.xlu1 %v4748_v61, 256 }
 0x188   :  { %4754 = vbcast.lane.b32.xlu1 %v4748_v61, 264 }
 0x18c   :  { %4761 = vbcast.lane.b32.xlu1 %v4759_v38, 256 }
 0x190   :  { %4765 = vbcast.lane.b32.xlu1 %v4759_v38, 264 }
 0x194   :  { %4776 = vbcast.lane.b32.xlu1 %v4770_v16, 264 }
 0x198   :  { %4787 = vbcast.lane.b32.xlu1 %v4781_v15, 264 }
 0x19c   :  { %4798 = vbcast.lane.b32.xlu1 %v4792_v60, 264 }
 0x19f   :  { %v5033_v56 = vpop.f32.mrb[0].mxu0 }
 0x1a0   :  { %4809 = vbcast.lane.b32.xlu1 %v4803_v3, 264  ;;  %v1221_v22 = vpop.f32.mrb[1].mxu0  ;;  %v5063_v23 = vpop.f32.mrb[0].mxu1  ;;  %v5244_v25 = vadd.f32 %v5033_v56, %v5961_v11 }
 0x1a1   :  { %v1710_v7 = vpop.f32.mrb[1].mxu1  ;;  %v5245_v53 = vadd.f32 %v1221_v22, %v5958_v54  ;;  %v5246_v27 = vadd.f32 %v5063_v23, %v5961_v11 }
 0x1a2   :  { %v4655_v35 = vmax.f32 %v5244_v25, 0.0  ;;  %v5247_v19 = vadd.f32 %v1710_v7, %v5958_v54 }
 0x1a3   :  { %v4654_v47 = vmax.f32 %v5245_v53, 0.0  ;;  %v4657_v9 = vmax.f32 %v5246_v27, 0.0 }
 0x1a4   :  { %v4656_v31 = vmax.f32 %v5247_v19, 0.0 }
 0x1cb   :  { %v5093_v13 = vpop.f32.mrb[2].mxu0 }
 0x1cc   :  { %v2199_v10 = vpop.f32.mrb[3].mxu0  ;;  %v5123_v24 = vpop.f32.mrb[2].mxu1  ;;  %v5248_v6 = vadd.f32 %v5093_v13, %v5961_v11 }
 0x1cd   :  { %v2688_v59 = vpop.f32.mrb[3].mxu1  ;;  %v5249_v46 = vadd.f32 %v2199_v10, %v5958_v54  ;;  %v5250_v29 = vadd.f32 %v5123_v24, %v5961_v11 }
 0x1ce   :  { %v4659_v55 = vmax.f32 %v5248_v6, 0.0  ;;  %v5251_v28 = vadd.f32 %v2688_v59, %v5958_v54 }
 0x1cf   :  { %v4658_v8 = vmax.f32 %v5249_v46, 0.0  ;;  %v4661_v18 = vmax.f32 %v5250_v29, 0.0 }
 0x1d0   :  { %v4660_v17 = vmax.f32 %v5251_v28, 0.0 }
 0x1e6   :  { %v4729_v63 = vpop.permute.xlu1 %4728  ;;  %v4773_v1 = vpop.permute.xlu0 %4772 }
 0x1e7   :  { %v4811_v33 = vadd.f32 %v4729_v63, %v4654_v47 }
 0x1e9   :  { %4827 = vst [vmem:[#allocation2] sm:$0xff] %v4811_v33 }
 0x1ea   :  { %v4733_v36 = vpop.permute.xlu1 %4732  ;;  %v4784_v20 = vpop.permute.xlu0 %4783 }
 0x1eb   :  { %v4812_v26 = vadd.f32 %v4733_v36, %v4655_v35 }
 0x1ed   :  { %4828 = vst [vmem:[#allocation2 + $0x8] sm:$0xff] %v4812_v26 }
 0x1ee   :  { %v4740_v49 = vpop.permute.xlu1 %4739  ;;  %v4795_v38 = vpop.permute.xlu0 %4794 }
 0x1ef   :  { %v4813_v62 = vadd.f32 %v4740_v49, %v4656_v31 }
 0x1f1   :  { %4829 = vst [vmem:[#allocation2 + $0x10] sm:$0xff] %v4813_v62 }
 0x1f2   :  { %v4744_v32 = vpop.permute.xlu1 %4743  ;;  %v4806_v19 = vpop.permute.xlu0 %4805 }
 0x1f3   :  { %v4814_v5 = vadd.f32 %v4744_v32, %v4657_v9 }
 0x1f5   :  { %4830 = vst [vmem:[#allocation2 + $0x18] sm:$0xff] %v4814_v5 }
 0x1f6   :  { %v4751_v44 = vpop.permute.xlu1 %4750 }
 0x1f7   :  { %v4815_v34 = vadd.f32 %v4751_v44, %v4658_v8  ;;  %v5153_v57 = vpop.f32.mrb[4].mxu0 }
 0x1f8   :  { %v5252_v39 = vadd.f32 %v5153_v57, %v5961_v11  ;;  %v3177_v40 = vpop.f32.mrb[5].mxu0  ;;  %v5183_v41 = vpop.f32.mrb[4].mxu1 }
 0x1f9   :  { %4831 = vst [vmem:[#allocation2 + $0x20] sm:$0xff] %v4815_v34  ;;  %v5253_v43 = vadd.f32 %v3177_v40, %v5958_v54  ;;  %v3666_v45 = vpop.f32.mrb[5].mxu1  ;;  %v5254_v50 = vadd.f32 %v5183_v41, %v5961_v11 }
 0x1fa   :  { %v4755_v51 = vpop.permute.xlu1 %4754  ;;  %v5255_v42 = vadd.f32 %v3666_v45, %v5958_v54  ;;  %v4663_v12 = vmax.f32 %v5252_v39, 0.0 }
 0x1fb   :  { %v4816_v4 = vadd.f32 %v4755_v51, %v4659_v55  ;;  %v4662_v2 = vmax.f32 %v5253_v43, 0.0  ;;  %v4665_v0 = vmax.f32 %v5254_v50, 0.0 }
 0x1fc   :  { %v4664_v16 = vmax.f32 %v5255_v42, 0.0 }
 0x1fd   :  { %4832 = vst [vmem:[#allocation2 + $0x28] sm:$0xff] %v4816_v4  ;;  %v4819_v52 = vadd.f32 %v4773_v1, %v4662_v2 }
 0x1fe   :  { %v4762_v30 = vpop.permute.xlu1 %4761  ;;  %v4821_v21 = vadd.f32 %v4784_v20, %v4664_v16 }
 0x1ff   :  { %v4817_v37 = vadd.f32 %v4762_v30, %v4660_v17  ;;  %4835 = vst [vmem:[#allocation2 + $0x40] sm:$0xff] %v4819_v52 }
 0x200   :  { %4837 = vst [vmem:[#allocation2 + $0x50] sm:$0xff] %v4821_v21 }
 0x201   :  { %4833 = vst [vmem:[#allocation2 + $0x30] sm:$0xff] %v4817_v37 }
 0x202   :  { %v4766_v14 = vpop.permute.xlu1 %4765 }
 0x203   :  { %v4818_v58 = vadd.f32 %v4766_v14, %v4661_v18 }
 0x205   :  { %4834 = vst [vmem:[#allocation2 + $0x38] sm:$0xff] %v4818_v58 }
 0x206   :  { %v4777_v15 = vpop.permute.xlu1 %4776 }
 0x207   :  { %v4820_v60 = vadd.f32 %v4777_v15, %v4663_v12 }
 0x209   :  { %4836 = vst [vmem:[#allocation2 + $0x48] sm:$0xff] %v4820_v60 }
 0x20a   :  { %v4788_v48 = vpop.permute.xlu1 %4787 }
 0x20b   :  { %v4822_v3 = vadd.f32 %v4788_v48, %v4665_v0 }
 0x20d   :  { %4838 = vst [vmem:[#allocation2 + $0x58] sm:$0xff] %v4822_v3 }
 0x20e   :  { %v4799_v61 = vpop.permute.xlu1 %4798 }
 0x212   :  { %v4810_v63 = vpop.permute.xlu1 %4809 }
 0x223   :  { %v5213_v56 = vpop.f32.mrb[6].mxu0 }
 0x224   :  { %v5256_v22 = vadd.f32 %v5213_v56, %v5961_v11  ;;  %v4155_v23 = vpop.f32.mrb[7].mxu0  ;;  %v5243_v7 = vpop.f32.mrb[6].mxu1 }
 0x225   :  { %v5257_v13 = vadd.f32 %v4155_v23, %v5958_v54  ;;  %v5258_v10 = vadd.f32 %v5243_v7, %v5961_v11  ;;  %v4644_v24 = vpop.f32.mrb[7].mxu1 }
 0x226   :  { %v4667_v59 = vmax.f32 %v5256_v22, 0.0  ;;  %v5259_v53 = vadd.f32 %v4644_v24, %v5958_v54 }
 0x227   :  { %v4666_v25 = vmax.f32 %v5257_v13, 0.0  ;;  %v4669_v47 = vmax.f32 %v5258_v10, 0.0 }
 0x228   :  { %v4824_v33 = vadd.f32 %v4799_v61, %v4667_v59  ;;  %v4668_v35 = vmax.f32 %v5259_v53, 0.0 }
 0x229   :  { %v4823_v36 = vadd.f32 %v4795_v38, %v4666_v25  ;;  %v4826_v26 = vadd.f32 %v4810_v63, %v4669_v47 }
 0x22a   :  { %4840 = vst [vmem:[#allocation2 + $0x68] sm:$0xff] %v4824_v33  ;;  %v4825_v27 = vadd.f32 %v4806_v19, %v4668_v35 }
 0x22b   :  { %4839 = vst [vmem:[#allocation2 + $0x60] sm:$0xff] %v4823_v36  ;;  %4842 = vst [vmem:[#allocation2 + $0x78] sm:$0xff] %v4826_v26 }
 0x22c   :  { %4841 = vst [vmem:[#allocation2 + $0x70] sm:$0xff] %v4825_v27 }
 0x22d   :  { %5368 = shalt.err (!%p5365_p4)
}
 0x22e   :  { %s5369_s13 = scalar_lea.hbm %s5995_s5, 2048 }
 0x22f   :  { %p5370_p5 = scmp.ne.s32.totalorder %s5995_s5, %s5369_s13  ;;  %p5373_p6 = scmp.lt.u32.totalorder %s5369_s13, %s5995_s5 }
 0x231   :  { %p5375_p7 = pnand %p5373_p6, %p5370_p5 }
 0x233   :  { %5378 = shalt.err (!%p5375_p7)
}
 0x234   :  { %s5391_s18 = smov 128   ;;  %s5392_s19 = smov 8  }
 0x235   :  { %4854 = dma.vmem_to_hbm [thread:$0]  %s4849_s9, 2048, %s5995_s5, [#allocation3], %s5391_s18, %s5391_s18, %s5392_s19  }
 0x236   :  { %5379 = dma.done.wait [#allocation3], 2048  }
 0x237   :  { %5380 = vsyncadd [#allocation3], 4294965248 }
 0x238   :  { %4858 = vsyncpa [#allocation3], 1 }

</bundles_post_ra>
